<compile_context>
chip_gen: v5e
topology: v5e:2x2
jax: 0.10.0
libtpu: 0.0.40
codegen_flags: <defaults>
</compile_context>

<pallas_src>
import functools

import jax
import jax.numpy as jnp
from jax.experimental import pallas as pl
from jax.experimental.pallas import tpu as pltpu

NUM_HIDDEN_LAYERS = 5   # self.layers in the PyTorch module
LANE = 128
SUBLANE = 8
MAX_TILE_B = 256


def _round_up(x, m):
    return (x + m - 1) // m * m


def bf_forward_kernel(xin_ref, win_ref, wfc_ref, wlast_ref, out_ref):
    hp = wfc_ref.shape[1]

    # Fused entry layer: [state, command, 1] @ blockdiag([w1 | wc], biases row).
    z = jnp.dot(xin_ref[...].astype(jnp.bfloat16), win_ref[...],
                preferred_element_type=jnp.float32)           # (TILE_B, 2*Hp)

    # ReLU + elementwise gating in f32 on the VPU (lane-aligned 128 split).
    out = jnp.maximum(z[:, :hp], 0.0)
    cout = jnp.maximum(z[:, hp:], 0.0)
    outx = out * cout

    # 5 bias-free hidden layers with ReLU (unrolled; weights stacked on axis 0).
    for i in range(NUM_HIDDEN_LAYERS):
        outx = jnp.maximum(
            jnp.dot(outx.astype(jnp.bfloat16), wfc_ref[i],
                    preferred_element_type=jnp.float32), 0.0)

    # Final projection (no bias, no activation); lane-dense (padded) store.
    out_ref[...] = jnp.dot(outx.astype(jnp.bfloat16), wlast_ref[...],
                           preferred_element_type=jnp.float32)


@functools.partial(jax.jit, static_argnames=("action_space",))
def bf_forward(state, command, params, action_space):
    """state: (B, state_space) f32; command: (B, 2) f32 -> (B, action_space) f32."""
    B = state.shape[0]
    w_in = params["w_in"]        # (Kin, 2*Hp)   bf16
    wfc = params["wfc"]          # (L, Hp, Hp)   bf16
    wlast = params["wlast"]      # (Hp, Ap)      bf16
    kin = w_in.shape[0]
    hp = wfc.shape[1]
    ap = wlast.shape[1]

    tile_b = min(MAX_TILE_B, _round_up(B, SUBLANE))
    bp = _round_up(B, tile_b)

    # Fused input [state, command, 1]; zero-pad batch rows to a tile multiple.
    xin = jnp.concatenate(
        [state, command, jnp.ones((B, 1), jnp.float32)], axis=1)
    xin = jnp.pad(xin, ((0, bp - B), (0, 0)))

    grid = (bp // tile_b,)
    flops = 2 * bp * (kin * 2 * hp + NUM_HIDDEN_LAYERS * hp * hp + hp * ap)
    bytes_accessed = (xin.size * 4 + w_in.size * 2 + wfc.size * 2
                      + wlast.size * 2 + bp * ap * 4)

    out_padded = pl.pallas_call(
        bf_forward_kernel,
        out_shape=jax.ShapeDtypeStruct((bp, ap), jnp.float32),
        grid_spec=pltpu.PrefetchScalarGridSpec(
            num_scalar_prefetch=0,
            grid=grid,
            in_specs=[
                pl.BlockSpec((tile_b, kin), lambda i: (i, 0)),
                pl.BlockSpec((kin, 2 * hp), lambda i: (0, 0)),
                pl.BlockSpec((NUM_HIDDEN_LAYERS, hp, hp), lambda i: (0, 0, 0)),
                pl.BlockSpec((hp, ap), lambda i: (0, 0)),
            ],
            out_specs=pl.BlockSpec((tile_b, ap), lambda i: (i, 0)),
        ),
        compiler_params=pltpu.CompilerParams(
            dimension_semantics=("parallel",)),
        cost_estimate=pl.CostEstimate(
            flops=flops, transcendentals=0, bytes_accessed=bytes_accessed),
    )(xin, w_in, wfc, wlast)

    return out_padded[:B, :action_space]


def init_params(seed, state_space, hidden_size, action_space):
    """Deterministic init mimicking torch.nn.Linear default U[-1/sqrt(fan_in), +...].

    Weights are stored pre-transposed as (in, out) and packed/padded for the
    kernel: entry weight is block-diagonal with biases folded into a ones-row;
    hidden/action feature axes are zero-padded to multiples of 128 lanes;
    kernel weights are cast to bf16 (f32 copies returned for the reference).
    """
    key = jax.random.PRNGKey(seed)
    ks = jax.random.split(key, 6)

    def unif(k, shape, fan_in):
        bound = 1.0 / (float(fan_in) ** 0.5)
        return jax.random.uniform(k, shape, jnp.float32, -bound, bound)

    w1 = unif(ks[0], (state_space, hidden_size), state_space)
    b1 = unif(ks[1], (hidden_size,), state_space)
    wc = unif(ks[2], (2, hidden_size), 2)
    bc = unif(ks[3], (hidden_size,), 2)
    wfc = unif(ks[4], (NUM_HIDDEN_LAYERS, hidden_size, hidden_size), hidden_size)
    wlast = unif(ks[5], (hidden_size, action_space), hidden_size)

    hp = _round_up(hidden_size, LANE)
    ap = _round_up(action_space, LANE)
    kin = state_space + 2 + 1   # state + command + ones column (for biases)

    # Block-diagonal fused entry weight: cols [0, Hp) <- fc1, cols [Hp, 2Hp) <- commands.
    w_in = jnp.zeros((kin, 2 * hp), jnp.float32)
    w_in = w_in.at[:state_space, :hidden_size].set(w1)
    w_in = w_in.at[state_space:state_space + 2, hp:hp + hidden_size].set(wc)
    w_in = w_in.at[state_space + 2, :hidden_size].set(b1)
    w_in = w_in.at[state_space + 2, hp:hp + hidden_size].set(bc)

    wfc_p = jnp.zeros((NUM_HIDDEN_LAYERS, hp, hp), jnp.float32)
    wfc_p = wfc_p.at[:, :hidden_size, :hidden_size].set(wfc)
    wlast_p = jnp.zeros((hp, ap), jnp.float32)
    wlast_p = wlast_p.at[:hidden_size, :action_space].set(wlast)

    params = {
        "w_in": w_in.astype(jnp.bfloat16),
        "wfc": wfc_p.astype(jnp.bfloat16),
        "wlast": wlast_p.astype(jnp.bfloat16),
    }
    ref_params = {"w1": w1, "b1": b1, "wc": wc, "bc": bc,
                  "wfc": wfc, "wlast": wlast}
    return params, ref_params


def reference_forward(state, command, ref_params):
    """Mirrors the PyTorch forward with weights/activations quantized to bf16
    (matching the kernel's storage dtype) and f32 accumulation."""
    f32 = jnp.float32

    def q(x):
        return x.astype(jnp.bfloat16)

    def mm(x, w):
        return jnp.dot(q(x), q(w), preferred_element_type=f32)

    out = jax.nn.relu(mm(state, ref_params["w1"])
                      + q(ref_params["b1"]).astype(f32))
    cout = jax.nn.relu(mm(command, ref_params["wc"])
                       + q(ref_params["bc"]).astype(f32))
    outx = out * cout
    for i in range(NUM_HIDDEN_LAYERS):
        outx = jax.nn.relu(mm(outx, ref_params["wfc"][i]))
    return mm(outx, ref_params["wlast"])


if __name__ == "__main__":
    # Small shapes consistent with the module's constructor.
    batch = 2
    state_space = 16
    hidden_size = 32
    action_space = 4
    seed = 0

    params, ref_params = init_params(seed, state_space, hidden_size, action_space)

    key = jax.random.PRNGKey(0)
    k_s, _ = jax.random.split(key)
    state = jax.random.normal(k_s, (batch, state_space), jnp.float32)
    desire, elo = 1.0, 0.5
    command = jnp.tile(jnp.array([[desire, elo]], jnp.float32), (batch, 1))

    out = bf_forward(state, command, params, action_space)
    jax.block_until_ready(out)

    ref = reference_forward(state, command, ref_params)
    assert out.shape == (batch, action_space)
    assert jnp.allclose(out, ref, atol=1e-2, rtol=1e-2), \
        float(jnp.max(jnp.abs(out - ref)))

    print("KERNEL_OK")
</pallas_src>

<mosaic_0001>
module attributes {stable_mosaic.version = 11 : i64} {
  func.func @bf_forward_kernel(%arg0: i32, %arg1: memref<8x19xf32, #tpu.memory_space<vmem>>, %arg2: memref<19x256xbf16, #tpu.memory_space<vmem>>, %arg3: memref<5x128x128xbf16, #tpu.memory_space<vmem>>, %arg4: memref<128x128xbf16, #tpu.memory_space<vmem>>, %arg5: memref<8x128xf32, #tpu.memory_space<vmem>>) attributes {dimension_semantics = [#tpu.dimension_semantics<parallel>], iteration_bounds = array<i64: 1>, scalar_prefetch = 0 : i64, scratch_operands = 0 : i64, tpu.core_type = #tpu.core_type<tc>, window_params = [{transform_indices = @transform_0, window_bounds = array<i64: 8, 19>}, {pipeline_mode = #tpu.pipeline_mode<synchronous>, transform_indices = @transform_1, window_bounds = array<i64: 19, 256>}, {pipeline_mode = #tpu.pipeline_mode<synchronous>, transform_indices = @transform_2, window_bounds = array<i64: 5, 128, 128>}, {pipeline_mode = #tpu.pipeline_mode<synchronous>, transform_indices = @transform_3, window_bounds = array<i64: 128, 128>}, {transform_indices = @transform_4, window_bounds = array<i64: 8, 128>}]} {
    %c0 = arith.constant 0 : index
    %c0_0 = arith.constant 0 : index
    %0 = vector.load %arg1[%c0, %c0_0] : memref<8x19xf32, #tpu.memory_space<vmem>>, vector<8x19xf32>
    %1 = arith.truncf %0 : vector<8x19xf32> to vector<8x19xbf16>
    %c0_1 = arith.constant 0 : index
    %c0_2 = arith.constant 0 : index
    %2 = vector.load %arg2[%c0_1, %c0_2] : memref<19x256xbf16, #tpu.memory_space<vmem>>, vector<19x256xbf16>
    %cst = arith.constant dense<0.000000e+00> : vector<8x256xf32>
    %3 = tpu.matmul %1, %2, %cst {dimension_numbers = #tpu.dot_dimension_numbers<[1], [0], [0], [1], [0, 0, 1, 1], [], []>} : vector<8x19xbf16>, vector<19x256xbf16>, vector<8x256xf32> -> vector<8x256xf32>
    %4 = vector.extract_strided_slice %3 {offsets = [0, 0], sizes = [8, 128], strides = [1, 1]} : vector<8x256xf32> to vector<8x128xf32>
    %cst_3 = arith.constant 0.000000e+00 : f32
    %5 = vector.broadcast %cst_3 : f32 to vector<8x128xf32>
    %6 = arith.maximumf %4, %5 : vector<8x128xf32>
    %7 = vector.extract_strided_slice %3 {offsets = [0, 128], sizes = [8, 128], strides = [1, 1]} : vector<8x256xf32> to vector<8x128xf32>
    %cst_4 = arith.constant 0.000000e+00 : f32
    %8 = vector.broadcast %cst_4 : f32 to vector<8x128xf32>
    %9 = arith.maximumf %7, %8 : vector<8x128xf32>
    %10 = arith.mulf %6, %9 : vector<8x128xf32>
    %11 = arith.truncf %10 : vector<8x128xf32> to vector<8x128xbf16>
    %c0_5 = arith.constant 0 : index
    %c0_6 = arith.constant 0 : index
    %c0_7 = arith.constant 0 : index
    %12 = vector.load %arg3[%c0_5, %c0_6, %c0_7] : memref<5x128x128xbf16, #tpu.memory_space<vmem>>, vector<1x128x128xbf16>
    %13 = vector.shape_cast %12 : vector<1x128x128xbf16> to vector<128x128xbf16>
    %cst_8 = arith.constant dense<0.000000e+00> : vector<8x128xf32>
    %14 = tpu.matmul %11, %13, %cst_8 {dimension_numbers = #tpu.dot_dimension_numbers<[1], [0], [0], [1], [0, 0, 1, 1], [], []>} : vector<8x128xbf16>, vector<128x128xbf16>, vector<8x128xf32> -> vector<8x128xf32>
    %cst_9 = arith.constant 0.000000e+00 : f32
    %15 = vector.broadcast %cst_9 : f32 to vector<8x128xf32>
    %16 = arith.maximumf %14, %15 : vector<8x128xf32>
    %17 = arith.truncf %16 : vector<8x128xf32> to vector<8x128xbf16>
    %c1 = arith.constant 1 : index
    %c0_10 = arith.constant 0 : index
    %c0_11 = arith.constant 0 : index
    %18 = vector.load %arg3[%c1, %c0_10, %c0_11] : memref<5x128x128xbf16, #tpu.memory_space<vmem>>, vector<1x128x128xbf16>
    %19 = vector.shape_cast %18 : vector<1x128x128xbf16> to vector<128x128xbf16>
    %cst_12 = arith.constant dense<0.000000e+00> : vector<8x128xf32>
    %20 = tpu.matmul %17, %19, %cst_12 {dimension_numbers = #tpu.dot_dimension_numbers<[1], [0], [0], [1], [0, 0, 1, 1], [], []>} : vector<8x128xbf16>, vector<128x128xbf16>, vector<8x128xf32> -> vector<8x128xf32>
    %cst_13 = arith.constant 0.000000e+00 : f32
    %21 = vector.broadcast %cst_13 : f32 to vector<8x128xf32>
    %22 = arith.maximumf %20, %21 : vector<8x128xf32>
    %23 = arith.truncf %22 : vector<8x128xf32> to vector<8x128xbf16>
    %c2 = arith.constant 2 : index
    %c0_14 = arith.constant 0 : index
    %c0_15 = arith.constant 0 : index
    %24 = vector.load %arg3[%c2, %c0_14, %c0_15] : memref<5x128x128xbf16, #tpu.memory_space<vmem>>, vector<1x128x128xbf16>
    %25 = vector.shape_cast %24 : vector<1x128x128xbf16> to vector<128x128xbf16>
    %cst_16 = arith.constant dense<0.000000e+00> : vector<8x128xf32>
    %26 = tpu.matmul %23, %25, %cst_16 {dimension_numbers = #tpu.dot_dimension_numbers<[1], [0], [0], [1], [0, 0, 1, 1], [], []>} : vector<8x128xbf16>, vector<128x128xbf16>, vector<8x128xf32> -> vector<8x128xf32>
    %cst_17 = arith.constant 0.000000e+00 : f32
    %27 = vector.broadcast %cst_17 : f32 to vector<8x128xf32>
    %28 = arith.maximumf %26, %27 : vector<8x128xf32>
    %29 = arith.truncf %28 : vector<8x128xf32> to vector<8x128xbf16>
    %c3 = arith.constant 3 : index
    %c0_18 = arith.constant 0 : index
    %c0_19 = arith.constant 0 : index
    %30 = vector.load %arg3[%c3, %c0_18, %c0_19] : memref<5x128x128xbf16, #tpu.memory_space<vmem>>, vector<1x128x128xbf16>
    %31 = vector.shape_cast %30 : vector<1x128x128xbf16> to vector<128x128xbf16>
    %cst_20 = arith.constant dense<0.000000e+00> : vector<8x128xf32>
    %32 = tpu.matmul %29, %31, %cst_20 {dimension_numbers = #tpu.dot_dimension_numbers<[1], [0], [0], [1], [0, 0, 1, 1], [], []>} : vector<8x128xbf16>, vector<128x128xbf16>, vector<8x128xf32> -> vector<8x128xf32>
    %cst_21 = arith.constant 0.000000e+00 : f32
    %33 = vector.broadcast %cst_21 : f32 to vector<8x128xf32>
    %34 = arith.maximumf %32, %33 : vector<8x128xf32>
    %35 = arith.truncf %34 : vector<8x128xf32> to vector<8x128xbf16>
    %c4 = arith.constant 4 : index
    %c0_22 = arith.constant 0 : index
    %c0_23 = arith.constant 0 : index
    %36 = vector.load %arg3[%c4, %c0_22, %c0_23] : memref<5x128x128xbf16, #tpu.memory_space<vmem>>, vector<1x128x128xbf16>
    %37 = vector.shape_cast %36 : vector<1x128x128xbf16> to vector<128x128xbf16>
    %cst_24 = arith.constant dense<0.000000e+00> : vector<8x128xf32>
    %38 = tpu.matmul %35, %37, %cst_24 {dimension_numbers = #tpu.dot_dimension_numbers<[1], [0], [0], [1], [0, 0, 1, 1], [], []>} : vector<8x128xbf16>, vector<128x128xbf16>, vector<8x128xf32> -> vector<8x128xf32>
    %cst_25 = arith.constant 0.000000e+00 : f32
    %39 = vector.broadcast %cst_25 : f32 to vector<8x128xf32>
    %40 = arith.maximumf %38, %39 : vector<8x128xf32>
    %41 = arith.truncf %40 : vector<8x128xf32> to vector<8x128xbf16>
    %c0_26 = arith.constant 0 : index
    %c0_27 = arith.constant 0 : index
    %42 = vector.load %arg4[%c0_26, %c0_27] : memref<128x128xbf16, #tpu.memory_space<vmem>>, vector<128x128xbf16>
    %cst_28 = arith.constant dense<0.000000e+00> : vector<8x128xf32>
    %43 = tpu.matmul %41, %42, %cst_28 {dimension_numbers = #tpu.dot_dimension_numbers<[1], [0], [0], [1], [0, 0, 1, 1], [], []>} : vector<8x128xbf16>, vector<128x128xbf16>, vector<8x128xf32> -> vector<8x128xf32>
    %c0_29 = arith.constant 0 : index
    %c0_30 = arith.constant 0 : index
    %44 = vector.load %arg5[%c0_29, %c0_30] : memref<8x128xf32, #tpu.memory_space<vmem>>, vector<8x128xf32>
    tpu.vector_store %arg5[%c0_29, %c0_30], %43 {strides = array<i32>} : memref<8x128xf32, #tpu.memory_space<vmem>>, vector<8x128xf32>,
    return
  }
  func.func @transform_0(%arg0: i32) -> (i32, i32) {
    %c0_i32 = arith.constant 0 : i32
    %c0_i32_0 = arith.constant 0 : i32
    return %arg0, %c0_i32 : i32, i32
  }
  func.func @transform_1(%arg0: i32) -> (i32, i32) {
    %c0_i32 = arith.constant 0 : i32
    %c0_i32_0 = arith.constant 0 : i32
    %c0_i32_1 = arith.constant 0 : i32
    return %c0_i32, %c0_i32_0 : i32, i32
  }
  func.func @transform_2(%arg0: i32) -> (i32, i32, i32) {
    %c0_i32 = arith.constant 0 : i32
    %c0_i32_0 = arith.constant 0 : i32
    %c0_i32_1 = arith.constant 0 : i32
    %c0_i32_2 = arith.constant 0 : i32
    return %c0_i32, %c0_i32_0, %c0_i32_1 : i32, i32, i32
  }
  func.func @transform_3(%arg0: i32) -> (i32, i32) {
    %c0_i32 = arith.constant 0 : i32
    %c0_i32_0 = arith.constant 0 : i32
    %c0_i32_1 = arith.constant 0 : i32
    return %c0_i32, %c0_i32_0 : i32, i32
  }
  func.func @transform_4(%arg0: i32) -> (i32, i32) {
    %c0_i32 = arith.constant 0 : i32
    %c0_i32_0 = arith.constant 0 : i32
    return %arg0, %c0_i32 : i32, i32
  }
}

</mosaic_0001>

<bundles_post_ra>
// kernel: bf_forward.1
= control target key start
LH: loop header
LB: loop body
LE: loop exit
PB: predicated region body
PF: predicated region fallthrough
CT: control target
= control target key end

     0   :  { %9 = vsyncpa [#allocation3], 0  ;;  %s996_s0 = inlined_call_operand.vmem [shape: f32[8,19], index: 0, kind: input, shape index: {}]   ;;  %s997_s1 = inlined_call_operand.hbm [shape: bf16[19,256], index: 1, kind: input, shape index: {}]   ;;  %s998_s2 = inlined_call_operand.hbm [shape: bf16[5,128,128], index: 2, kind: input, shape index: {}]   ;;  %s999_s3 = inlined_call_operand.hbm [shape: bf16[128,128], index: 3, kind: input, shape index: {}]   ;;  %s1000_s4 = inlined_call_operand.vmem [shape: f32[8,128], index: 4, kind: output, shape index: {}]  }
   0x1   :  { %10 = vsyncpa [#allocation5], 0  ;;  %s30_s17 = sshll.u32 %s998_s2, 4  ;;  %s948_s18 = smov [#allocation4]   ;;  %s31_s17 = int_to_ptr.hbm [resolvable:$true] %s30_s17 }
   0x2   :  { %s32_s19 = sshll.u32 %s948_s18, 4  ;;  %s17_s22 = sshll.u32 %s997_s1, 4  ;;  %s33_s19 = int_to_ptr.vmem [resolvable:$true] %s32_s19  ;;  %s18_s22 = int_to_ptr.hbm [resolvable:$true] %s17_s22 }
   0x3   :  { %s949_s23 = smov 64   ;;  %s950_s24 = smov 4  }
   0x4   :  { %38 = dma.hbm_to_vmem [thread:$0]  %s31_s17, 5120, %s33_s19, [#allocation5], %s949_s23, %s949_s23, %s950_s24  }
   0x5   :  { %s951_s25 = smov [#allocation2]   ;;  %s952_s27 = smov 128  }
   0x6   :  { %s19_s26 = sshll.u32 %s951_s25, 4  ;;  %s953_s28 = smov 8   ;;  %s20_s26 = int_to_ptr.vmem [resolvable:$true] %s19_s26 }
   0x7   :  { %25 = dma.hbm_to_vmem [thread:$0]  %s18_s22, 384, %s20_s26, [#allocation3], %s952_s27, %s952_s27, %s953_s28  }
   0x8   :  { %s43_s30 = sshll.u32 %s999_s3, 4  ;;  %s954_s5 = smov [#allocation6]   ;;  %s44_s30 = int_to_ptr.hbm [resolvable:$true] %s43_s30 }
   0x9   :  { %s45_s6 = sshll.u32 %s954_s5, 4  ;;  %s46_s6 = int_to_ptr.vmem [resolvable:$true] %s45_s6 }
   0xa   :  { %51 = dma.hbm_to_vmem [thread:$0]  %s44_s30, 1024, %s46_s6, [#allocation5], %s949_s23, %s949_s23, %s950_s24  }
   0xb   :  { %944 = dma.done.wait [#allocation3], 384  }
   0xc   :  { %945 = vsyncadd [#allocation3], 4294966912 }
   0xd   :  { %946 = dma.done.wait [#allocation5], 6144  }
   0xe   :  { %947 = vsyncadd [#allocation5], 4294961152  ;;  %vm89_vm0 = vcmask 1040384   ;;  %vm90_vm1 = vcmask 1041408   ;;  %v955_v0 = vmov 65535   ;;  %v823_v6 = vld [vmem:[#allocation4 + $0x38] sm:$0xff] }
   0xf   :  { %v91_v1 = vsel %vm89_vm0, 4294967295, %v955_v0  ;;  %v69_v2 = vld [vmem:[#allocation2 + $0x10] sm:$0x33]  ;;  %v614_v9 = vld [vmem:[#allocation2] sm:$0xf]  ;;  %193 = vmatpush.bf16.msra.mxu2 %v823_v6  ;;  %v822_v13 = vld [vmem:[#allocation4 + $0x30] sm:$0xff] }
  0x10   :  { %v77_v3 = vunpack.c.l.b16 %v69_v2  ;;  %v78_v4 = vunpack.c.h.b16 %v69_v2  ;;  %v92_v5 = vsel %vm90_vm1, %v91_v1, 0  ;;  %v815_v10 = vld [vmem:[#allocation2 + $0x4] sm:$0xf0]  ;;  %v814_v11 = vld [vmem:[#allocation2 + $0x4] sm:$0xf]  ;;  %vm85_vm2 = vcmask 154624  }
  0x11   :  { %v616_v12 = vld [vmem:[#allocation2 + $0x8] sm:$0xf0]  ;;  %v615_v16 = vor.u32 %v815_v10, %v614_v9  ;;  %v65_v18 = vld [vmem:[%s996_s0] sm:$0xff]  ;;  %v820_v21 = vld [vmem:[#allocation4 + $0x20] sm:$0xff] }
  0x12   :  { %v81_v7 = vpack.c.b16 %v77_v3, %v77_v3  ;;  %v82_v8 = vpack.c.b16 %v78_v4, %v78_v4  ;;  %v619_v17 = vor.u32 %v814_v11, %v616_v12  ;;  %v821_v19 = vld [vmem:[#allocation4 + $0x28] sm:$0xff]  ;;  %v66_v20 = vpack.c.bf16 %v65_v18, %v65_v18  ;;  %v819_v22 = vld [vmem:[#allocation4 + $0x18] sm:$0xff]  ;;  %v818_v23 = vld [vmem:[#allocation4 + $0x10] sm:$0xff] }
  0x13   :  { %194 = vmatpush.bf16.msra.mxu2 %v822_v13  ;;  %v817_v24 = vld [vmem:[#allocation4 + $0x8] sm:$0xff]  ;;  %v816_v25 = vld [vmem:[#allocation4] sm:$0xff]  ;;  %v831_v26 = vld [vmem:[#allocation4 + $0x78] sm:$0xff] }
  0x14   :  { %v94_v14 = vand.u32 %v92_v5, %v81_v7  ;;  %v97_v15 = vand.u32 %v92_v5, %v82_v8  ;;  %273 = vmatpush.bf16.msra.mxu3 %v831_v26  ;;  %v830_v27 = vld [vmem:[#allocation4 + $0x70] sm:$0xff]  ;;  %v829_v28 = vld [vmem:[#allocation4 + $0x68] sm:$0xff]  ;;  %v828_v29 = vld [vmem:[#allocation4 + $0x60] sm:$0xff] }
  0x15   :  { %v827_v30 = vld [vmem:[#allocation4 + $0x58] sm:$0xff]  ;;  %v826_v31 = vld [vmem:[#allocation4 + $0x50] sm:$0xff]  ;;  %v825_v32 = vld [vmem:[#allocation4 + $0x48] sm:$0xff] }
  0x16   :  { %105 = vmatpush.bf16.msra.mxu0 %v94_v14  ;;  %118 = vmatpush.bf16.msra.mxu1 %v97_v15  ;;  %v824_v41 = vld [vmem:[#allocation4 + $0x40] sm:$0xff]  ;;  %v839_v42 = vld [vmem:[#allocation4 + $0xb8] sm:$0xff]  ;;  %v838_v43 = vld [vmem:[#allocation4 + $0xb0] sm:$0xff] }
  0x17   :  { %195 = vmatpush.bf16.msra.mxu2 %v821_v19  ;;  %v837_v44 = vld [vmem:[#allocation4 + $0xa8] sm:$0xff]  ;;  %v836_v45 = vld [vmem:[#allocation4 + $0xa0] sm:$0xff]  ;;  %v835_v46 = vld [vmem:[#allocation4 + $0x98] sm:$0xff] }
  0x18   :  { %274 = vmatpush.bf16.msra.mxu3 %v830_v27  ;;  %v834_v47 = vld [vmem:[#allocation4 + $0x90] sm:$0xff]  ;;  %v833_v48 = vld [vmem:[#allocation4 + $0x88] sm:$0xff]  ;;  %v832_v53 = vld [vmem:[#allocation4 + $0x80] sm:$0xff] }
  0x19   :  { %v847_v54 = vld [vmem:[#allocation4 + $0xf8] sm:$0xff]  ;;  %v846_v55 = vld [vmem:[#allocation4 + $0xf0] sm:$0xff]  ;;  %v845_v56 = vld [vmem:[#allocation4 + $0xe8] sm:$0xff] }
  0x1a   :  { %106 = vmatpush.bf16.msra.mxu0 %v615_v16  ;;  %119 = vmatpush.bf16.msra.mxu1 %v619_v17  ;;  %v844_v57 = vld [vmem:[#allocation4 + $0xe0] sm:$0xff]  ;;  %v843_v58 = vld [vmem:[#allocation4 + $0xd8] sm:$0xff]  ;;  %v842_v59 = vld [vmem:[#allocation4 + $0xd0] sm:$0xff] }
  0x1b   :  { %196 = vmatpush.bf16.msra.mxu2 %v820_v21  ;;  %v841_v60 = vld [vmem:[#allocation4 + $0xc8] sm:$0xff]  ;;  %v840_v1 = vld [vmem:[#allocation4 + $0xc0] sm:$0xff]  ;;  %v855_v2 = vld [vmem:[#allocation4 + $0x138] sm:$0xff] }
  0x1c   :  { %275 = vmatpush.bf16.msra.mxu3 %v829_v28  ;;  %v854_v3 = vld [vmem:[#allocation4 + $0x130] sm:$0xff]  ;;  %v853_v4 = vld [vmem:[#allocation4 + $0x128] sm:$0xff]  ;;  %v852_v5 = vld [vmem:[#allocation4 + $0x120] sm:$0xff] }
  0x1d   :  { %620 = vmatmul.msk.bf16.vlgmr.msra.gmra.mxu0 %vm85_vm2, %v66_v20  ;;  %621 = vmatmul.msk.bf16.vlgmr.msra.gmra.mxu1 %vm85_vm2, %v66_v20  ;;  %v851_v6 = vld [vmem:[#allocation4 + $0x118] sm:$0xff]  ;;  %v850_v7 = vld [vmem:[#allocation4 + $0x110] sm:$0xff]  ;;  %v849_v8 = vld [vmem:[#allocation4 + $0x108] sm:$0xff] }
  0x1e   :  { %353 = vmatpush.bf16.msrb.mxu0 %v839_v42  ;;  %433 = vmatpush.bf16.msrb.mxu1 %v847_v54  ;;  %v848_v13 = vld [vmem:[#allocation4 + $0x100] sm:$0xff]  ;;  %v863_v14 = vld [vmem:[#allocation6 + $0x38] sm:$0xff]  ;;  %v862_v15 = vld [vmem:[#allocation6 + $0x30] sm:$0xff] }
  0x1f   :  { %197 = vmatpush.bf16.msra.mxu2 %v819_v22  ;;  %v861_v16 = vld [vmem:[#allocation6 + $0x28] sm:$0xff]  ;;  %v860_v17 = vld [vmem:[#allocation6 + $0x20] sm:$0xff]  ;;  %v859_v18 = vld [vmem:[#allocation6 + $0x18] sm:$0xff] }
  0x20   :  { %276 = vmatpush.bf16.msra.mxu3 %v828_v29  ;;  %v858_v19 = vld [vmem:[#allocation6 + $0x10] sm:$0xff]  ;;  %v857_v20 = vld [vmem:[#allocation6 + $0x8] sm:$0xff] }
  0x22   :  { %354 = vmatpush.bf16.msrb.mxu0 %v838_v43  ;;  %434 = vmatpush.bf16.msrb.mxu1 %v846_v55 }
  0x23   :  { %198 = vmatpush.bf16.msra.mxu2 %v818_v23 }
  0x24   :  { %277 = vmatpush.bf16.msra.mxu3 %v827_v30 }
  0x26   :  { %355 = vmatpush.bf16.msrb.mxu0 %v837_v44  ;;  %435 = vmatpush.bf16.msrb.mxu1 %v845_v56 }
  0x27   :  { %199 = vmatpush.bf16.msra.mxu2 %v817_v24 }
  0x28   :  { %278 = vmatpush.bf16.msra.mxu3 %v826_v31 }
  0x2a   :  { %356 = vmatpush.bf16.msrb.mxu0 %v836_v45  ;;  %436 = vmatpush.bf16.msrb.mxu1 %v844_v57 }
  0x2b   :  { %200 = vmatpush.bf16.msra.mxu2 %v816_v25  ;;  %v856_v25 = vld [vmem:[#allocation6] sm:$0xff] }
  0x2c   :  { %279 = vmatpush.bf16.msra.mxu3 %v825_v32 }
  0x2e   :  { %357 = vmatpush.bf16.msrb.mxu0 %v835_v46  ;;  %437 = vmatpush.bf16.msrb.mxu1 %v843_v58 }
  0x2f   :  { %513 = vmatpush.bf16.msrb.mxu2 %v855_v2 }
  0x30   :  { %280 = vmatpush.bf16.msra.mxu3 %v824_v41 }
  0x32   :  { %358 = vmatpush.bf16.msrb.mxu0 %v834_v47  ;;  %438 = vmatpush.bf16.msrb.mxu1 %v842_v59 }
  0x33   :  { %514 = vmatpush.bf16.msrb.mxu2 %v854_v3 }
  0x34   :  { %592 = vmatpush.bf16.msrb.mxu3 %v863_v14 }
  0x36   :  { %359 = vmatpush.bf16.msrb.mxu0 %v833_v48  ;;  %439 = vmatpush.bf16.msrb.mxu1 %v841_v60 }
  0x37   :  { %515 = vmatpush.bf16.msrb.mxu2 %v853_v4 }
  0x38   :  { %593 = vmatpush.bf16.msrb.mxu3 %v862_v15 }
  0x3a   :  { %360 = vmatpush.bf16.msrb.mxu0 %v832_v53  ;;  %440 = vmatpush.bf16.msrb.mxu1 %v840_v1 }
  0x3b   :  { %516 = vmatpush.bf16.msrb.mxu2 %v852_v5 }
  0x3c   :  { %594 = vmatpush.bf16.msrb.mxu3 %v861_v16 }
  0x3f   :  { %517 = vmatpush.bf16.msrb.mxu2 %v851_v6 }
  0x40   :  { %595 = vmatpush.bf16.msrb.mxu3 %v860_v17 }
  0x43   :  { %518 = vmatpush.bf16.msrb.mxu2 %v850_v7 }
  0x44   :  { %596 = vmatpush.bf16.msrb.mxu3 %v859_v18 }
  0x47   :  { %519 = vmatpush.bf16.msrb.mxu2 %v849_v8 }
  0x48   :  { %597 = vmatpush.bf16.msrb.mxu3 %v858_v19 }
  0x4b   :  { %520 = vmatpush.bf16.msrb.mxu2 %v848_v13 }
  0x4c   :  { %598 = vmatpush.bf16.msrb.mxu3 %v857_v20 }
  0x50   :  { %599 = vmatpush.bf16.msrb.mxu3 %v856_v25 }
  0x9a   :  { %v108_v33 = vpop.f32.mrf.mxu0  ;;  %v121_v34 = vpop.f32.mrf.mxu1 }
  0x9b   :  { %v125_v35 = vmax.f32 %v108_v33, 0.0  ;;  %v126_v36 = vmax.f32 %v121_v34, 0.0 }
  0x9d   :  { %v127_v37 = vmul.f32 %v126_v36, %v125_v35 }
  0x9f   :  { %v128_v38 = vpack.c.bf16 %v127_v37, %v127_v37 }
  0xa1   :  { %201 = vmatmul.bf16.vlgmr.msra.gmra.mxu2 %v128_v38 }
  0xa2   :  { %v110_v39 = vpop.f32.mrf.mxu0  ;;  %v123_v40 = vpop.f32.mrf.mxu1 }
 0x124   :  { %v202_v49 = vpop.f32.mrf.mxu2 }
 0x125   :  { %v206_v50 = vmax.f32 %v202_v49, 0.0 }
 0x127   :  { %v207_v51 = vpack.c.bf16 %v206_v50, %v206_v50 }
 0x129   :  { %281 = vmatmul.bf16.vlgmr.msra.gmra.mxu3 %v207_v51 }
 0x12c   :  { %v204_v52 = vpop.f32.mrf.mxu2 }
 0x1ac   :  { %v282_v61 = vpop.f32.mrf.mxu3 }
 0x1ad   :  { %v286_v62 = vmax.f32 %v282_v61, 0.0 }
 0x1af   :  { %v287_v63 = vpack.c.bf16 %v286_v62, %v286_v62 }
 0x1b1   :  { %361 = vmatmul.bf16.vlgmr.msrb.gmra.mxu0 %v287_v63 }
 0x1b4   :  { %v284_v0 = vpop.f32.mrf.mxu3 }
 0x22e   :  { %v362_v9 = vpop.f32.mrf.mxu0 }
 0x22f   :  { %v366_v10 = vmax.f32 %v362_v9, 0.0 }
 0x231   :  { %v367_v11 = vpack.c.bf16 %v366_v10, %v366_v10 }
 0x233   :  { %441 = vmatmul.bf16.vlgmr.msrb.gmra.mxu1 %v367_v11 }
 0x236   :  { %v364_v12 = vpop.f32.mrf.mxu0 }
 0x2b0   :  { %v442_v21 = vpop.f32.mrf.mxu1 }
 0x2b1   :  { %v446_v22 = vmax.f32 %v442_v21, 0.0 }
 0x2b3   :  { %v447_v23 = vpack.c.bf16 %v446_v22, %v446_v22 }
 0x2b5   :  { %521 = vmatmul.bf16.vlgmr.msrb.gmra.mxu2 %v447_v23 }
 0x2b8   :  { %v444_v24 = vpop.f32.mrf.mxu1 }
 0x338   :  { %v522_v26 = vpop.f32.mrf.mxu2 }
 0x339   :  { %v526_v27 = vmax.f32 %v522_v26, 0.0 }
 0x33b   :  { %v527_v28 = vpack.c.bf16 %v526_v27, %v526_v27 }
 0x33d   :  { %600 = vmatmul.bf16.vlgmr.msrb.gmra.mxu3 %v527_v28 }
 0x340   :  { %v524_v29 = vpop.f32.mrf.mxu2 }
 0x3c0   :  { %v601_v30 = vpop.f32.mrf.mxu3 }
 0x3c1   :  { %605 = vst [vmem:[%s1000_s4] sm:$0xff] %v601_v30 }
 0x3c8   :  { %v603_v31 = vpop.f32.mrf.mxu3 }
 0x3c9   :  { %610 = vsyncpa [#allocation3], 1 }
 0x3ca   :  { %611 = vsyncpa [#allocation5], 1 }

</bundles_post_ra>
